<compile_context>
chip_gen: v5e
topology: v5e:2x2
jax: 0.10.0
libtpu: 0.0.40
codegen_flags: <defaults>
</compile_context>

<pallas_src>
import functools

import jax
import jax.numpy as jnp
from jax.experimental import pallas as pl
from jax.experimental.pallas import tpu as pltpu


LANE = 128                       # padded feature / hidden / output width (lane-dense)
TM = 512                         # row tile (multiple of 128); N=2708 -> 6 tiles (even)
VMEM_BUDGET = 40 * 1024 * 1024   # single-shot path budget (safe on v7x's 64 MiB)
VMEM_LIMIT = 48 * 1024 * 1024    # explicit scoped-VMEM limit for all generations


def _round_up(x, m):
    return ((x + m - 1) // m) * m


def _pad_to(x, rows, cols):
    pr, pc = rows - x.shape[0], cols - x.shape[1]
    if pr or pc:
        x = jnp.pad(x, ((0, pr), (0, pc)))
    return x


def _prep_bf16(x, rows, cols):
    """Cast to bf16 *before* padding so the pad writes half the bytes."""
    return _pad_to(x.astype(jnp.bfloat16), rows, cols)


def _pick_tk(kp, target=2048):
    """Largest multiple of 128 that divides kp and is <= target (128 always works)."""
    nb = kp // LANE
    best = LANE
    for blocks in range(1, target // LANE + 1):
        if nb % blocks == 0:
            best = blocks * LANE
    return best


# --------------------------------------------------------------------------
# Kernels
# --------------------------------------------------------------------------
def _make_single_shot_kernel(has_bias, relu, has_w2):
    """y = act(LHS_rowblock @ RHS + b) [@ W2], full K resident, no scratch."""

    def kernel(*refs):
        lhs_ref, rhs_ref = refs[0], refs[1]
        idx = 2
        b_ref = w2_ref = None
        if has_bias:
            b_ref = refs[idx]
            idx += 1
        if has_w2:
            w2_ref = refs[idx]
            idx += 1
        o_ref = refs[idx]

        y = jnp.dot(lhs_ref[...], rhs_ref[...],
                    preferred_element_type=jnp.float32)
        if has_bias:
            y = y + b_ref[...]
        if relu:
            y = jnp.maximum(y, 0.0)
        if has_w2:
            y = jnp.dot(y.astype(w2_ref.dtype), w2_ref[...],
                        preferred_element_type=jnp.float32)
        o_ref[...] = y.astype(o_ref.dtype)

    return kernel


def _make_ktiled_kernel(has_bias, relu, has_w2):
    """Fallback for very large K: (row, K) grid with f32 VMEM accumulator."""

    def kernel(*refs):
        lhs_ref, rhs_ref = refs[0], refs[1]
        idx = 2
        b_ref = w2_ref = None
        if has_bias:
            b_ref = refs[idx]
            idx += 1
        if has_w2:
            w2_ref = refs[idx]
            idx += 1
        o_ref, acc_ref = refs[idx], refs[idx + 1]

        k = pl.program_id(1)

        @pl.when(k == 0)
        def _init():
            acc_ref[...] = jnp.zeros_like(acc_ref)

        acc_ref[...] += jnp.dot(lhs_ref[...], rhs_ref[...],
                                preferred_element_type=jnp.float32)

        @pl.when(k == pl.num_programs(1) - 1)
        def _finalize():
            y = acc_ref[...]
            if has_bias:
                y = y + b_ref[...]
            if relu:
                y = jnp.maximum(y, 0.0)
            if has_w2:
                y = jnp.dot(y.astype(w2_ref.dtype), w2_ref[...],
                            preferred_element_type=jnp.float32)
            o_ref[...] = y.astype(o_ref.dtype)

    return kernel


# --------------------------------------------------------------------------
# Tiled fused matmul wrapper
# --------------------------------------------------------------------------
def _fused_matmul(lhs_p, rhs_p, bias_p=None, relu=False, w2_p=None,
                  out_dtype=jnp.float32, tm=TM):
    """act(lhs_p @ rhs_p + bias) [@ w2] on pre-padded bf16 operands.

    lhs_p : (Mp, Kp)   bf16, Mp % tm == 0, Kp % 128 == 0 — streamed row tiles
    rhs_p : (Kp, LANE) bf16 — kept resident (single-shot path)
    bias_p: (1, LANE)  f32 or None — resident
    w2_p  : (LANE, LANE) bf16 or None — resident, applied per row tile
    Returns (Mp, LANE) in out_dtype.
    """
    mp, kp = lhs_p.shape
    assert rhs_p.shape == (kp, LANE)
    assert mp % tm == 0 and kp % LANE == 0

    extra_arrays, specs_1d, specs_2d = [], [], []
    if bias_p is not None:
        extra_arrays.append(bias_p.reshape(1, LANE).astype(jnp.float32))
        specs_1d.append(pl.BlockSpec((1, LANE), lambda i: (0, 0)))
        specs_2d.append(pl.BlockSpec((1, LANE), lambda i, k: (0, 0)))
    if w2_p is not None:
        assert w2_p.shape == (LANE, LANE)
        extra_arrays.append(w2_p.astype(jnp.bfloat16))
        specs_1d.append(pl.BlockSpec((LANE, LANE), lambda i: (0, 0)))
        specs_2d.append(pl.BlockSpec((LANE, LANE), lambda i, k: (0, 0)))

    out_bytes = jnp.dtype(out_dtype).itemsize
    vmem_1d = (2 * tm * kp * 2            # double-buffered LHS row block (bf16)
               + 2 * kp * LANE * 2        # resident RHS (bf16)
               + 2 * tm * LANE * out_bytes
               + 2 * (LANE * LANE * 2 + LANE * 4))

    if vmem_1d <= VMEM_BUDGET:
        # Single-shot path: 1-D grid over row tiles, no reduction axis,
        # no accumulator scratch, RHS only DMA'd once.
        kernel = _make_single_shot_kernel(bias_p is not None, relu,
                                          w2_p is not None)
        return pl.pallas_call(
            kernel,
            out_shape=jax.ShapeDtypeStruct((mp, LANE), out_dtype),
            grid_spec=pltpu.PrefetchScalarGridSpec(
                num_scalar_prefetch=0,
                grid=(mp // tm,),
                in_specs=[pl.BlockSpec((tm, kp), lambda i: (i, 0)),
                          pl.BlockSpec((kp, LANE), lambda i: (0, 0))]
                         + specs_1d,
                out_specs=pl.BlockSpec((tm, LANE), lambda i: (i, 0)),
            ),
            compiler_params=pltpu.CompilerParams(
                dimension_semantics=("parallel",),
                vmem_limit_bytes=VMEM_LIMIT),
        )(lhs_p, rhs_p, *extra_arrays)

    # Large-graph fallback: (row, K) grid, tk chosen to divide Kp exactly
    # (no extra K padding streamed from HBM).
    tk = _pick_tk(kp)
    kernel = _make_ktiled_kernel(bias_p is not None, relu, w2_p is not None)
    return pl.pallas_call(
        kernel,
        out_shape=jax.ShapeDtypeStruct((mp, LANE), out_dtype),
        grid_spec=pltpu.PrefetchScalarGridSpec(
            num_scalar_prefetch=0,
            grid=(mp // tm, kp // tk),
            in_specs=[pl.BlockSpec((tm, tk), lambda i, k: (i, k)),
                      pl.BlockSpec((tk, LANE), lambda i, k: (k, 0))]
                     + specs_2d,
            out_specs=pl.BlockSpec((tm, LANE), lambda i, k: (i, 0)),
            scratch_shapes=[pltpu.VMEM((tm, LANE), jnp.float32)],
        ),
        compiler_params=pltpu.CompilerParams(
            dimension_semantics=("parallel", "arbitrary"),
            vmem_limit_bytes=VMEM_LIMIT),
    )(lhs_p, rhs_p, *extra_arrays)


# --------------------------------------------------------------------------
# GCN forward
# --------------------------------------------------------------------------
def gcn_forward(adjacency, feature, w1, b1, w2, b2):
    """2-layer GCN:  A @ relu(A @ X @ W1 + b1) @ W2 + b2."""
    n = feature.shape[0]
    f_in, hidden = w1.shape
    out_dim = w2.shape[1]
    assert adjacency.shape == (n, n)
    assert hidden <= LANE and out_dim <= LANE

    tm = min(TM, _round_up(n, LANE))      # row tile, multiple of 128
    mp = _round_up(n, tm)                 # padded node count (rows AND K of A)
    kf = _round_up(f_in, LANE)            # padded input feature width

    # Pad + cast every large operand exactly once (bf16 cast before pad).
    a_bf = _prep_bf16(adjacency, mp, mp)          # (Mp, Mp) — shared by BOTH aggregations
    x_bf = _prep_bf16(feature, mp, kf)            # (Mp, Kf)
    w1_bf = _prep_bf16(w1, kf, LANE)              # (Kf, 128)
    w2_bf = _prep_bf16(w2, LANE, LANE)            # (128, 128)
    b1_p = jnp.pad(b1.astype(jnp.float32), (0, LANE - hidden)).reshape(1, LANE)
    b2_p = jnp.pad(b2.astype(jnp.float32), (0, LANE - out_dim)).reshape(1, LANE)

    # 1) feature transform:   support1 = X @ W1                       (Mp,128) bf16
    support1 = _fused_matmul(x_bf, w1_bf, out_dtype=jnp.bfloat16, tm=tm)

    # 2) layer-1 aggregate fused with layer-2 feature transform:
    #    support2 = relu(A @ support1 + b1) @ W2                      (Mp,128) bf16
    support2 = _fused_matmul(a_bf, support1, bias_p=b1_p, relu=True,
                             w2_p=w2_bf, out_dtype=jnp.bfloat16, tm=tm)

    # 3) layer-2 aggregate:   logits = A @ support2 + b2              (Mp,128) f32
    logits = _fused_matmul(a_bf, support2, bias_p=b2_p,
                           out_dtype=jnp.float32, tm=tm)

    return logits[:n, :out_dim]


# --------------------------------------------------------------------------
# Parameter init / test data (mirrors the torch module defaults)
# --------------------------------------------------------------------------
def kaiming_uniform(key, shape):
    """torch.nn.init.kaiming_uniform_ on a 2-D (in, out) weight:
    fan_in = tensor.size(1); bound = sqrt(6 / fan_in)."""
    fan_in = shape[1]
    bound = (6.0 / fan_in) ** 0.5
    return jax.random.uniform(key, shape, jnp.float32, minval=-bound, maxval=bound)


def build_normalized_adjacency(key, n):
    """Dense D^-1/2 (A + I) D^-1/2 for a random undirected graph."""
    raw = jax.random.uniform(key, (n, n))
    a = (raw > 0.8).astype(jnp.float32)
    a = jnp.maximum(a, a.T)                      # symmetric
    a = a + jnp.eye(n, dtype=jnp.float32)        # self-loops
    deg = jnp.sum(a, axis=1)
    d_inv_sqrt = 1.0 / jnp.sqrt(deg)
    return a * d_inv_sqrt[:, None] * d_inv_sqrt[None, :]


if __name__ == "__main__":
    # Small shapes consistent with the module (input_dim -> 16 -> 7).
    N = 64          # number of graph nodes
    INPUT_DIM = 32  # node feature dim (module default is 1433; small here)
    HIDDEN = 16
    OUT = 7

    key = jax.random.PRNGKey(0)
    k_adj, k_feat, k_w1, k_w2 = jax.random.split(key, 4)

    adjacency = build_normalized_adjacency(k_adj, N)
    feature = jax.random.normal(k_feat, (N, INPUT_DIM), jnp.float32)

    # GraphConvolution parameters (kaiming_uniform weights, zero biases).
    w1 = kaiming_uniform(k_w1, (INPUT_DIM, HIDDEN))
    b1 = jnp.zeros((HIDDEN,), jnp.float32)
    w2 = kaiming_uniform(k_w2, (HIDDEN, OUT))
    b2 = jnp.zeros((OUT,), jnp.float32)

    logits = jax.jit(gcn_forward)(adjacency, feature, w1, b1, w2, b2)
    jax.block_until_ready(logits)
    assert logits.shape == (N, OUT)

    # Matching-precision reference (bf16 MXU inputs, f32 accumulation).
    bf16 = functools.partial(jnp.asarray, dtype=jnp.bfloat16)
    s1 = jnp.dot(bf16(feature), bf16(w1), preferred_element_type=jnp.float32)
    h = jnp.maximum(
        jnp.dot(bf16(adjacency), bf16(s1), preferred_element_type=jnp.float32) + b1,
        0.0)
    s2 = jnp.dot(bf16(h), bf16(w2), preferred_element_type=jnp.float32)
    logits_ref = (
        jnp.dot(bf16(adjacency), bf16(s2), preferred_element_type=jnp.float32) + b2)

    err = float(jnp.max(jnp.abs(logits - logits_ref)))
    assert jnp.allclose(logits, logits_ref, atol=2e-3, rtol=2e-3), err

    print("KERNEL_OK")
</pallas_src>

<mosaic_0001>
module attributes {stable_mosaic.version = 11 : i64} {
  func.func @kernel(%arg0: i32, %arg1: memref<128x128xbf16, #tpu.memory_space<vmem>>, %arg2: memref<128x128xbf16, #tpu.memory_space<vmem>>, %arg3: memref<1x128xf32, #tpu.memory_space<vmem>>, %arg4: memref<128x128xf32, #tpu.memory_space<vmem>>) attributes {dimension_semantics = [#tpu.dimension_semantics<parallel>], iteration_bounds = array<i64: 1>, scalar_prefetch = 0 : i64, scratch_operands = 0 : i64, tpu.core_type = #tpu.core_type<tc>, window_params = [{transform_indices = @transform_0, window_bounds = array<i64: 128, 128>}, {pipeline_mode = #tpu.pipeline_mode<synchronous>, transform_indices = @transform_1, window_bounds = array<i64: 128, 128>}, {pipeline_mode = #tpu.pipeline_mode<synchronous>, transform_indices = @transform_2, window_bounds = array<i64: 1, 128>}, {transform_indices = @transform_3, window_bounds = array<i64: 128, 128>}]} {
    %c0 = arith.constant 0 : index
    %c0_0 = arith.constant 0 : index
    %0 = vector.load %arg1[%c0, %c0_0] : memref<128x128xbf16, #tpu.memory_space<vmem>>, vector<128x128xbf16>
    %c0_1 = arith.constant 0 : index
    %c0_2 = arith.constant 0 : index
    %1 = vector.load %arg2[%c0_1, %c0_2] : memref<128x128xbf16, #tpu.memory_space<vmem>>, vector<128x128xbf16>
    %cst = arith.constant dense<0.000000e+00> : vector<128x128xf32>
    %2 = tpu.matmul %0, %1, %cst {dimension_numbers = #tpu.dot_dimension_numbers<[1], [0], [0], [1], [0, 0, 1, 1], [], []>} : vector<128x128xbf16>, vector<128x128xbf16>, vector<128x128xf32> -> vector<128x128xf32>
    %c0_3 = arith.constant 0 : index
    %c0_4 = arith.constant 0 : index
    %3 = vector.load %arg3[%c0_3, %c0_4] : memref<1x128xf32, #tpu.memory_space<vmem>>, vector<1x128xf32>
    %4 = vector.broadcast %3 : vector<1x128xf32> to vector<128x128xf32>
    %5 = arith.addf %2, %4 : vector<128x128xf32>
    %c0_5 = arith.constant 0 : index
    %c0_6 = arith.constant 0 : index
    %6 = vector.load %arg4[%c0_5, %c0_6] : memref<128x128xf32, #tpu.memory_space<vmem>>, vector<128x128xf32>
    tpu.vector_store %arg4[%c0_5, %c0_6], %5 {strides = array<i32>} : memref<128x128xf32, #tpu.memory_space<vmem>>, vector<128x128xf32>,
    return
  }
  func.func @transform_0(%arg0: i32) -> (i32, i32) {
    %c0_i32 = arith.constant 0 : i32
    %c0_i32_0 = arith.constant 0 : i32
    return %arg0, %c0_i32 : i32, i32
  }
  func.func @transform_1(%arg0: i32) -> (i32, i32) {
    %c0_i32 = arith.constant 0 : i32
    %c0_i32_0 = arith.constant 0 : i32
    %c0_i32_1 = arith.constant 0 : i32
    return %c0_i32, %c0_i32_0 : i32, i32
  }
  func.func @transform_2(%arg0: i32) -> (i32, i32) {
    %c0_i32 = arith.constant 0 : i32
    %c0_i32_0 = arith.constant 0 : i32
    %c0_i32_1 = arith.constant 0 : i32
    return %c0_i32, %c0_i32_0 : i32, i32
  }
  func.func @transform_3(%arg0: i32) -> (i32, i32) {
    %c0_i32 = arith.constant 0 : i32
    %c0_i32_0 = arith.constant 0 : i32
    return %arg0, %c0_i32 : i32, i32
  }
}

module attributes {stable_mosaic.version = 11 : i64} {
  func.func @kernel(%arg0: i32, %arg1: memref<128x128xbf16, #tpu.memory_space<vmem>>, %arg2: memref<128x128xbf16, #tpu.memory_space<vmem>>, %arg3: memref<1x128xf32, #tpu.memory_space<vmem>>, %arg4: memref<128x128xbf16, #tpu.memory_space<vmem>>, %arg5: memref<128x128xbf16, #tpu.memory_space<vmem>>) attributes {dimension_semantics = [#tpu.dimension_semantics<parallel>], iteration_bounds = array<i64: 1>, scalar_prefetch = 0 : i64, scratch_operands = 0 : i64, tpu.core_type = #tpu.core_type<tc>, window_params = [{transform_indices = @transform_0, window_bounds = array<i64: 128, 128>}, {pipeline_mode = #tpu.pipeline_mode<synchronous>, transform_indices = @transform_1, window_bounds = array<i64: 128, 128>}, {pipeline_mode = #tpu.pipeline_mode<synchronous>, transform_indices = @transform_2, window_bounds = array<i64: 1, 128>}, {pipeline_mode = #tpu.pipeline_mode<synchronous>, transform_indices = @transform_3, window_bounds = array<i64: 128, 128>}, {transform_indices = @transform_4, window_bounds = array<i64: 128, 128>}]} {
    %c0 = arith.constant 0 : index
    %c0_0 = arith.constant 0 : index
    %0 = vector.load %arg1[%c0, %c0_0] : memref<128x128xbf16, #tpu.memory_space<vmem>>, vector<128x128xbf16>
    %c0_1 = arith.constant 0 : index
    %c0_2 = arith.constant 0 : index
    %1 = vector.load %arg2[%c0_1, %c0_2] : memref<128x128xbf16, #tpu.memory_space<vmem>>, vector<128x128xbf16>
    %cst = arith.constant dense<0.000000e+00> : vector<128x128xf32>
    %2 = tpu.matmul %0, %1, %cst {dimension_numbers = #tpu.dot_dimension_numbers<[1], [0], [0], [1], [0, 0, 1, 1], [], []>} : vector<128x128xbf16>, vector<128x128xbf16>, vector<128x128xf32> -> vector<128x128xf32>
    %c0_3 = arith.constant 0 : index
    %c0_4 = arith.constant 0 : index
    %3 = vector.load %arg3[%c0_3, %c0_4] : memref<1x128xf32, #tpu.memory_space<vmem>>, vector<1x128xf32>
    %4 = vector.broadcast %3 : vector<1x128xf32> to vector<128x128xf32>
    %5 = arith.addf %2, %4 : vector<128x128xf32>
    %cst_5 = arith.constant 0.000000e+00 : f32
    %6 = vector.broadcast %cst_5 : f32 to vector<128x128xf32>
    %7 = arith.maximumf %5, %6 : vector<128x128xf32>
    %8 = arith.truncf %7 : vector<128x128xf32> to vector<128x128xbf16>
    %c0_6 = arith.constant 0 : index
    %c0_7 = arith.constant 0 : index
    %9 = vector.load %arg4[%c0_6, %c0_7] : memref<128x128xbf16, #tpu.memory_space<vmem>>, vector<128x128xbf16>
    %cst_8 = arith.constant dense<0.000000e+00> : vector<128x128xf32>
    %10 = tpu.matmul %8, %9, %cst_8 {dimension_numbers = #tpu.dot_dimension_numbers<[1], [0], [0], [1], [0, 0, 1, 1], [], []>} : vector<128x128xbf16>, vector<128x128xbf16>, vector<128x128xf32> -> vector<128x128xf32>
    %11 = arith.truncf %10 : vector<128x128xf32> to vector<128x128xbf16>
    %c0_9 = arith.constant 0 : index
    %c0_10 = arith.constant 0 : index
    %12 = vector.load %arg5[%c0_9, %c0_10] : memref<128x128xbf16, #tpu.memory_space<vmem>>, vector<128x128xbf16>
    tpu.vector_store %arg5[%c0_9, %c0_10], %11 {strides = array<i32>} : memref<128x128xbf16, #tpu.memory_space<vmem>>, vector<128x128xbf16>,
    return
  }
  func.func @transform_0(%arg0: i32) -> (i32, i32) {
    %c0_i32 = arith.constant 0 : i32
    %c0_i32_0 = arith.constant 0 : i32
    return %arg0, %c0_i32 : i32, i32
  }
  func.func @transform_1(%arg0: i32) -> (i32, i32) {
    %c0_i32 = arith.constant 0 : i32
    %c0_i32_0 = arith.constant 0 : i32
    %c0_i32_1 = arith.constant 0 : i32
    return %c0_i32, %c0_i32_0 : i32, i32
  }
  func.func @transform_2(%arg0: i32) -> (i32, i32) {
    %c0_i32 = arith.constant 0 : i32
    %c0_i32_0 = arith.constant 0 : i32
    %c0_i32_1 = arith.constant 0 : i32
    return %c0_i32, %c0_i32_0 : i32, i32
  }
  func.func @transform_3(%arg0: i32) -> (i32, i32) {
    %c0_i32 = arith.constant 0 : i32
    %c0_i32_0 = arith.constant 0 : i32
    %c0_i32_1 = arith.constant 0 : i32
    return %c0_i32, %c0_i32_0 : i32, i32
  }
  func.func @transform_4(%arg0: i32) -> (i32, i32) {
    %c0_i32 = arith.constant 0 : i32
    %c0_i32_0 = arith.constant 0 : i32
    return %arg0, %c0_i32 : i32, i32
  }
}

module attributes {stable_mosaic.version = 11 : i64} {
  func.func @kernel(%arg0: i32, %arg1: memref<128x128xbf16, #tpu.memory_space<vmem>>, %arg2: memref<128x128xbf16, #tpu.memory_space<vmem>>, %arg3: memref<128x128xbf16, #tpu.memory_space<vmem>>) attributes {dimension_semantics = [#tpu.dimension_semantics<parallel>], iteration_bounds = array<i64: 1>, scalar_prefetch = 0 : i64, scratch_operands = 0 : i64, tpu.core_type = #tpu.core_type<tc>, window_params = [{transform_indices = @transform_0, window_bounds = array<i64: 128, 128>}, {pipeline_mode = #tpu.pipeline_mode<synchronous>, transform_indices = @transform_1, window_bounds = array<i64: 128, 128>}, {transform_indices = @transform_2, window_bounds = array<i64: 128, 128>}]} {
    %c0 = arith.constant 0 : index
    %c0_0 = arith.constant 0 : index
    %0 = vector.load %arg1[%c0, %c0_0] : memref<128x128xbf16, #tpu.memory_space<vmem>>, vector<128x128xbf16>
    %c0_1 = arith.constant 0 : index
    %c0_2 = arith.constant 0 : index
    %1 = vector.load %arg2[%c0_1, %c0_2] : memref<128x128xbf16, #tpu.memory_space<vmem>>, vector<128x128xbf16>
    %cst = arith.constant dense<0.000000e+00> : vector<128x128xf32>
    %2 = tpu.matmul %0, %1, %cst {dimension_numbers = #tpu.dot_dimension_numbers<[1], [0], [0], [1], [0, 0, 1, 1], [], []>} : vector<128x128xbf16>, vector<128x128xbf16>, vector<128x128xf32> -> vector<128x128xf32>
    %3 = arith.truncf %2 : vector<128x128xf32> to vector<128x128xbf16>
    %c0_3 = arith.constant 0 : index
    %c0_4 = arith.constant 0 : index
    %4 = vector.load %arg3[%c0_3, %c0_4] : memref<128x128xbf16, #tpu.memory_space<vmem>>, vector<128x128xbf16>
    tpu.vector_store %arg3[%c0_3, %c0_4], %3 {strides = array<i32>} : memref<128x128xbf16, #tpu.memory_space<vmem>>, vector<128x128xbf16>,
    return
  }
  func.func @transform_0(%arg0: i32) -> (i32, i32) {
    %c0_i32 = arith.constant 0 : i32
    %c0_i32_0 = arith.constant 0 : i32
    return %arg0, %c0_i32 : i32, i32
  }
  func.func @transform_1(%arg0: i32) -> (i32, i32) {
    %c0_i32 = arith.constant 0 : i32
    %c0_i32_0 = arith.constant 0 : i32
    %c0_i32_1 = arith.constant 0 : i32
    return %c0_i32, %c0_i32_0 : i32, i32
  }
  func.func @transform_2(%arg0: i32) -> (i32, i32) {
    %c0_i32 = arith.constant 0 : i32
    %c0_i32_0 = arith.constant 0 : i32
    return %arg0, %c0_i32 : i32, i32
  }
}

</mosaic_0001>

<bundles_post_ra>
// kernel: gcn_forward.5
= control target key start
LH: loop header
LB: loop body
LE: loop exit
PB: predicated region body
PF: predicated region fallthrough
CT: control target
= control target key end

     0   :  { %s439_s1 = inlined_call_operand.vmem [shape: bf16[128,128], index: 1, kind: input, shape index: {}]   ;;  %s440_s2 = inlined_call_operand.vmem [shape: f32[1,128], index: 2, kind: input, shape index: {}]   ;;  %s441_s0 = inlined_call_operand.vmem [shape: bf16[128,128], index: 0, kind: input, shape index: {}]   ;;  %s442_s3 = inlined_call_operand.vmem [shape: f32[128,128], index: 3, kind: output, shape index: {}]  }
   0x1   :  { %v294_v0 = vld [vmem:[%s439_s1 + $0x38] sm:$0xff]  ;;  %v293_v1 = vld [vmem:[%s439_s1 + $0x30] sm:$0xff]  ;;  %v292_v2 = vld [vmem:[%s439_s1 + $0x28] sm:$0xff] }
   0x2   :  { %146 = vmatpush.bf16.msra.mxu0 %v294_v0  ;;  %295 = vmatpush.bf16.msra.mxu1 %v294_v0  ;;  %v291_v3 = vld [vmem:[%s439_s1 + $0x20] sm:$0xff]  ;;  %v290_v4 = vld [vmem:[%s439_s1 + $0x18] sm:$0xff]  ;;  %v289_v5 = vld [vmem:[%s439_s1 + $0x10] sm:$0xff] }
   0x3   :  { %296 = vmatpush.bf16.msra.mxu2 %v294_v0  ;;  %297 = vmatpush.bf16.msra.mxu3 %v294_v0  ;;  %v288_v6 = vld [vmem:[%s439_s1 + $0x8] sm:$0xff]  ;;  %v287_v7 = vld [vmem:[%s439_s1] sm:$0xff]  ;;  %v281_v9 = vld [vmem:[%s441_s0 + $0x10] sm:$0xff] }
   0x4   :  { %v279_v8 = vld [vmem:[%s441_s0] sm:$0xff]  ;;  %v285_v11 = vld [vmem:[%s441_s0 + $0x30] sm:$0xff]  ;;  %v280_v12 = vld [vmem:[%s441_s0 + $0x8] sm:$0xff] }
   0x5   :  { %v283_v10 = vld [vmem:[%s441_s0 + $0x20] sm:$0xff]  ;;  %v282_v13 = vld [vmem:[%s441_s0 + $0x18] sm:$0xff]  ;;  %v284_v14 = vld [vmem:[%s441_s0 + $0x28] sm:$0xff] }
   0x6   :  { %147 = vmatpush.bf16.msra.mxu0 %v293_v1  ;;  %298 = vmatpush.bf16.msra.mxu1 %v293_v1  ;;  %v286_v15 = vld [vmem:[%s441_s0 + $0x38] sm:$0xff]  ;;  %v319_v16 = vld [vmem:[%s440_s2] ss:$0 sm:$0xff] }
   0x7   :  { %299 = vmatpush.bf16.msra.mxu2 %v293_v1  ;;  %300 = vmatpush.bf16.msra.mxu3 %v293_v1 }
   0xa   :  { %148 = vmatpush.bf16.msra.mxu0 %v292_v2  ;;  %301 = vmatpush.bf16.msra.mxu1 %v292_v2 }
   0xb   :  { %302 = vmatpush.bf16.msra.mxu2 %v292_v2  ;;  %303 = vmatpush.bf16.msra.mxu3 %v292_v2 }
   0xe   :  { %149 = vmatpush.bf16.msra.mxu0 %v291_v3  ;;  %304 = vmatpush.bf16.msra.mxu1 %v291_v3 }
   0xf   :  { %305 = vmatpush.bf16.msra.mxu2 %v291_v3  ;;  %306 = vmatpush.bf16.msra.mxu3 %v291_v3 }
  0x12   :  { %150 = vmatpush.bf16.msra.mxu0 %v290_v4  ;;  %307 = vmatpush.bf16.msra.mxu1 %v290_v4 }
  0x13   :  { %308 = vmatpush.bf16.msra.mxu2 %v290_v4  ;;  %309 = vmatpush.bf16.msra.mxu3 %v290_v4 }
  0x16   :  { %151 = vmatpush.bf16.msra.mxu0 %v289_v5  ;;  %310 = vmatpush.bf16.msra.mxu1 %v289_v5 }
  0x17   :  { %311 = vmatpush.bf16.msra.mxu2 %v289_v5  ;;  %312 = vmatpush.bf16.msra.mxu3 %v289_v5 }
  0x1a   :  { %152 = vmatpush.bf16.msra.mxu0 %v288_v6  ;;  %313 = vmatpush.bf16.msra.mxu1 %v288_v6 }
  0x1b   :  { %314 = vmatpush.bf16.msra.mxu2 %v288_v6  ;;  %315 = vmatpush.bf16.msra.mxu3 %v288_v6 }
  0x1e   :  { %153 = vmatpush.bf16.msra.mxu0 %v287_v7  ;;  %316 = vmatpush.bf16.msra.mxu1 %v287_v7 }
  0x1f   :  { %317 = vmatpush.bf16.msra.mxu2 %v287_v7  ;;  %318 = vmatpush.bf16.msra.mxu3 %v287_v7 }
  0x21   :  { %154 = vmatmul.bf16.vlgmr.msra.gmra.mxu0 %v279_v8  ;;  %164 = vmatmul.bf16.vlgmr.msra.gmra.mxu1 %v281_v9 }
  0x22   :  { %174 = vmatmul.bf16.vlgmr.msra.gmra.mxu2 %v283_v10  ;;  %184 = vmatmul.bf16.vlgmr.msra.gmra.mxu3 %v285_v11 }
  0x31   :  { %159 = vmatmul.bf16.gmra.mxu0 %v280_v12  ;;  %169 = vmatmul.bf16.gmra.mxu1 %v282_v13 }
  0x32   :  { %179 = vmatmul.bf16.gmra.mxu2 %v284_v14  ;;  %189 = vmatmul.bf16.gmra.mxu3 %v286_v15 }
  0x9e   :  { %v155_v17 = vpop.f32.mrf.mxu0  ;;  %v165_v18 = vpop.f32.mrf.mxu1 }
  0x9f   :  { %v156_v19 = vadd.f32 %v319_v16, %v155_v17  ;;  %v166_v20 = vadd.f32 %v319_v16, %v165_v18 }
  0xa1   :  { %195 = vst [vmem:[%s442_s3] sm:$0xff] %v156_v19 }
  0xa2   :  { %199 = vst [vmem:[%s442_s3 + $0x20] sm:$0xff] %v166_v20 }
  0xa5   :  { %v175_v21 = vpop.f32.mrf.mxu2  ;;  %v185_v22 = vpop.f32.mrf.mxu3 }
  0xa6   :  { %v176_v23 = vadd.f32 %v319_v16, %v175_v21  ;;  %v186_v24 = vadd.f32 %v319_v16, %v185_v22  ;;  %v157_v25 = vpop.f32.mrf.mxu0  ;;  %v167_v26 = vpop.f32.mrf.mxu1 }
  0xa7   :  { %v158_v27 = vadd.f32 %v319_v16, %v157_v25  ;;  %v168_v28 = vadd.f32 %v319_v16, %v167_v26 }
  0xa8   :  { %203 = vst [vmem:[%s442_s3 + $0x40] sm:$0xff] %v176_v23 }
  0xa9   :  { %207 = vst [vmem:[%s442_s3 + $0x60] sm:$0xff] %v186_v24 }
  0xaa   :  { %196 = vst [vmem:[%s442_s3 + $0x8] sm:$0xff] %v158_v27 }
  0xab   :  { %200 = vst [vmem:[%s442_s3 + $0x28] sm:$0xff] %v168_v28 }
  0xad   :  { %v177_v29 = vpop.f32.mrf.mxu2  ;;  %v187_v30 = vpop.f32.mrf.mxu3 }
  0xae   :  { %v178_v31 = vadd.f32 %v319_v16, %v177_v29  ;;  %v188_v32 = vadd.f32 %v319_v16, %v187_v30  ;;  %v160_v33 = vpop.f32.mrf.mxu0  ;;  %v170_v34 = vpop.f32.mrf.mxu1 }
  0xaf   :  { %v161_v35 = vadd.f32 %v319_v16, %v160_v33  ;;  %v171_v36 = vadd.f32 %v319_v16, %v170_v34 }
  0xb0   :  { %204 = vst [vmem:[%s442_s3 + $0x48] sm:$0xff] %v178_v31 }
  0xb1   :  { %208 = vst [vmem:[%s442_s3 + $0x68] sm:$0xff] %v188_v32 }
  0xb2   :  { %197 = vst [vmem:[%s442_s3 + $0x10] sm:$0xff] %v161_v35 }
  0xb3   :  { %201 = vst [vmem:[%s442_s3 + $0x30] sm:$0xff] %v171_v36 }
  0xb5   :  { %v180_v37 = vpop.f32.mrf.mxu2  ;;  %v190_v38 = vpop.f32.mrf.mxu3 }
  0xb6   :  { %v181_v39 = vadd.f32 %v319_v16, %v180_v37  ;;  %v191_v40 = vadd.f32 %v319_v16, %v190_v38  ;;  %v162_v41 = vpop.f32.mrf.mxu0  ;;  %v172_v42 = vpop.f32.mrf.mxu1 }
  0xb7   :  { %v163_v43 = vadd.f32 %v319_v16, %v162_v41  ;;  %v173_v44 = vadd.f32 %v319_v16, %v172_v42 }
  0xb8   :  { %205 = vst [vmem:[%s442_s3 + $0x50] sm:$0xff] %v181_v39 }
  0xb9   :  { %209 = vst [vmem:[%s442_s3 + $0x70] sm:$0xff] %v191_v40 }
  0xba   :  { %198 = vst [vmem:[%s442_s3 + $0x18] sm:$0xff] %v163_v43 }
  0xbb   :  { %202 = vst [vmem:[%s442_s3 + $0x38] sm:$0xff] %v173_v44 }
  0xbd   :  { %v182_v45 = vpop.f32.mrf.mxu2  ;;  %v192_v46 = vpop.f32.mrf.mxu3 }
  0xbe   :  { %v183_v47 = vadd.f32 %v319_v16, %v182_v45  ;;  %v193_v48 = vadd.f32 %v319_v16, %v192_v46 }
  0xc0   :  { %206 = vst [vmem:[%s442_s3 + $0x58] sm:$0xff] %v183_v47 }
  0xc1   :  { %210 = vst [vmem:[%s442_s3 + $0x78] sm:$0xff] %v193_v48 }

// kernel: gcn_forward.4
= control target key start
LH: loop header
LB: loop body
LE: loop exit
PB: predicated region body
PF: predicated region fallthrough
CT: control target
= control target key end

     0   :  { %s679_s1 = inlined_call_operand.vmem [shape: bf16[128,128], index: 1, kind: input, shape index: {}]   ;;  %s680_s2 = inlined_call_operand.vmem [shape: f32[1,128], index: 2, kind: input, shape index: {}]   ;;  %s681_s0 = inlined_call_operand.vmem [shape: bf16[128,128], index: 0, kind: input, shape index: {}]   ;;  %s682_s3 = inlined_call_operand.vmem [shape: bf16[128,128], index: 3, kind: input, shape index: {}]   ;;  %s683_s4 = inlined_call_operand.vmem [shape: bf16[128,128], index: 4, kind: output, shape index: {}]  }
   0x1   :  { %v482_v0 = vld [vmem:[%s679_s1 + $0x38] sm:$0xff]  ;;  %v481_v1 = vld [vmem:[%s679_s1 + $0x30] sm:$0xff]  ;;  %v480_v2 = vld [vmem:[%s679_s1 + $0x28] sm:$0xff] }
   0x2   :  { %149 = vmatpush.bf16.msra.mxu0 %v482_v0  ;;  %538 = vmatpush.bf16.msra.mxu2 %v482_v0  ;;  %v479_v3 = vld [vmem:[%s679_s1 + $0x20] sm:$0xff]  ;;  %v478_v4 = vld [vmem:[%s679_s1 + $0x18] sm:$0xff]  ;;  %v477_v5 = vld [vmem:[%s679_s1 + $0x10] sm:$0xff] }
   0x3   :  { %v476_v6 = vld [vmem:[%s679_s1 + $0x8] sm:$0xff]  ;;  %v475_v7 = vld [vmem:[%s679_s1] sm:$0xff]  ;;  %v490_v12 = vld [vmem:[%s682_s3 + $0x38] sm:$0xff] }
   0x4   :  { %v467_v8 = vld [vmem:[%s681_s0] sm:$0xff]  ;;  %v468_v10 = vld [vmem:[%s681_s0 + $0x8] sm:$0xff]  ;;  %286 = vmatpush.bf16.msra.mxu1 %v490_v12  ;;  %v489_v13 = vld [vmem:[%s682_s3 + $0x30] sm:$0xff]  ;;  %546 = vmatpush.bf16.msra.mxu3 %v490_v12 }
   0x5   :  { %v471_v9 = vld [vmem:[%s681_s0 + $0x20] sm:$0xff]  ;;  %v472_v11 = vld [vmem:[%s681_s0 + $0x28] sm:$0xff]  ;;  %v469_v16 = vld [vmem:[%s681_s0 + $0x10] sm:$0xff] }
   0x6   :  { %150 = vmatpush.bf16.msra.mxu0 %v481_v1  ;;  %539 = vmatpush.bf16.msra.mxu2 %v481_v1  ;;  %v488_v14 = vld [vmem:[%s682_s3 + $0x28] sm:$0xff]  ;;  %v487_v15 = vld [vmem:[%s682_s3 + $0x20] sm:$0xff]  ;;  %v473_v17 = vld [vmem:[%s681_s0 + $0x30] sm:$0xff] }
   0x7   :  { %v470_v18 = vld [vmem:[%s681_s0 + $0x18] sm:$0xff]  ;;  %v485_v21 = vld [vmem:[%s682_s3 + $0x10] sm:$0xff]  ;;  %v484_v22 = vld [vmem:[%s682_s3 + $0x8] sm:$0xff] }
   0x8   :  { %287 = vmatpush.bf16.msra.mxu1 %v489_v13  ;;  %547 = vmatpush.bf16.msra.mxu3 %v489_v13  ;;  %v474_v19 = vld [vmem:[%s681_s0 + $0x38] sm:$0xff]  ;;  %v483_v23 = vld [vmem:[%s682_s3] sm:$0xff] }
   0x9   :  { %v486_v20 = vld [vmem:[%s682_s3 + $0x18] sm:$0xff]  ;;  %v554_v25 = vld [vmem:[%s680_s2] ss:$0 sm:$0xff] }
   0xa   :  { %151 = vmatpush.bf16.msra.mxu0 %v480_v2  ;;  %540 = vmatpush.bf16.msra.mxu2 %v480_v2 }
   0xc   :  { %288 = vmatpush.bf16.msra.mxu1 %v488_v14  ;;  %548 = vmatpush.bf16.msra.mxu3 %v488_v14 }
   0xe   :  { %152 = vmatpush.bf16.msra.mxu0 %v479_v3  ;;  %541 = vmatpush.bf16.msra.mxu2 %v479_v3 }
  0x10   :  { %289 = vmatpush.bf16.msra.mxu1 %v487_v15  ;;  %549 = vmatpush.bf16.msra.mxu3 %v487_v15 }
  0x12   :  { %153 = vmatpush.bf16.msra.mxu0 %v478_v4  ;;  %542 = vmatpush.bf16.msra.mxu2 %v478_v4 }
  0x14   :  { %290 = vmatpush.bf16.msra.mxu1 %v486_v20  ;;  %550 = vmatpush.bf16.msra.mxu3 %v486_v20 }
  0x16   :  { %154 = vmatpush.bf16.msra.mxu0 %v477_v5  ;;  %543 = vmatpush.bf16.msra.mxu2 %v477_v5 }
  0x18   :  { %291 = vmatpush.bf16.msra.mxu1 %v485_v21  ;;  %551 = vmatpush.bf16.msra.mxu3 %v485_v21 }
  0x1a   :  { %155 = vmatpush.bf16.msra.mxu0 %v476_v6  ;;  %544 = vmatpush.bf16.msra.mxu2 %v476_v6 }
  0x1c   :  { %292 = vmatpush.bf16.msra.mxu1 %v484_v22  ;;  %552 = vmatpush.bf16.msra.mxu3 %v484_v22 }
  0x1e   :  { %156 = vmatpush.bf16.msra.mxu0 %v475_v7  ;;  %545 = vmatpush.bf16.msra.mxu2 %v475_v7 }
  0x20   :  { %293 = vmatpush.bf16.msra.mxu1 %v483_v23  ;;  %553 = vmatpush.bf16.msra.mxu3 %v483_v23 }
  0x21   :  { %157 = vmatmul.bf16.vlgmr.msra.gmra.mxu0 %v467_v8  ;;  %177 = vmatmul.bf16.vlgmr.msra.gmra.mxu2 %v471_v9 }
  0x31   :  { %162 = vmatmul.bf16.gmra.mxu0 %v468_v10  ;;  %182 = vmatmul.bf16.gmra.mxu2 %v472_v11 }
  0x41   :  { %167 = vmatmul.bf16.gmra.mxu0 %v469_v16  ;;  %187 = vmatmul.bf16.gmra.mxu2 %v473_v17 }
  0x51   :  { %172 = vmatmul.bf16.gmra.mxu0 %v470_v18  ;;  %192 = vmatmul.bf16.gmra.mxu2 %v474_v19 }
  0x9e   :  { %v158_v24 = vpop.f32.mrf.mxu0 }
  0x9f   :  { %v159_v26 = vadd.f32 %v554_v25, %v158_v24 }
  0xa1   :  { %v198_v29 = vmax.f32 %v159_v26, 0.0 }
  0xa4   :  { %v178_v27 = vpop.f32.mrf.mxu2 }
  0xa5   :  { %v179_v32 = vadd.f32 %v554_v25, %v178_v27 }
  0xa6   :  { %v160_v28 = vpop.f32.mrf.mxu0 }
  0xa7   :  { %v161_v30 = vadd.f32 %v554_v25, %v160_v28  ;;  %v206_v37 = vmax.f32 %v179_v32, 0.0 }
  0xa9   :  { %v199_v31 = vmax.f32 %v161_v30, 0.0 }
  0xab   :  { %v214_v33 = vpack.c.bf16 %v199_v31, %v198_v29 }
  0xac   :  { %v180_v34 = vpop.f32.mrf.mxu2 }
  0xad   :  { %v181_v35 = vadd.f32 %v554_v25, %v180_v34  ;;  %294 = vmatmul.bf16.vlgmr.msra.gmra.mxu1 %v214_v33 }
  0xae   :  { %v163_v36 = vpop.f32.mrf.mxu0 }
  0xaf   :  { %v207_v38 = vmax.f32 %v181_v35, 0.0  ;;  %v164_v40 = vadd.f32 %v554_v25, %v163_v36 }
  0xb1   :  { %v218_v39 = vpack.c.bf16 %v207_v38, %v206_v37  ;;  %v200_v43 = vmax.f32 %v164_v40, 0.0 }
  0xb3   :  { %314 = vmatmul.bf16.vlgmr.msra.gmra.mxu3 %v218_v39 }
  0xb4   :  { %v183_v41 = vpop.f32.mrf.mxu2 }
  0xb5   :  { %v184_v46 = vadd.f32 %v554_v25, %v183_v41 }
  0xb6   :  { %v165_v42 = vpop.f32.mrf.mxu0 }
  0xb7   :  { %v166_v44 = vadd.f32 %v554_v25, %v165_v42  ;;  %v208_v51 = vmax.f32 %v184_v46, 0.0 }
  0xb9   :  { %v201_v45 = vmax.f32 %v166_v44, 0.0 }
  0xbb   :  { %v215_v47 = vpack.c.bf16 %v201_v45, %v200_v43 }
  0xbc   :  { %v185_v48 = vpop.f32.mrf.mxu2 }
  0xbd   :  { %v186_v49 = vadd.f32 %v554_v25, %v185_v48  ;;  %299 = vmatmul.bf16.gmra.mxu1 %v215_v47 }
  0xbe   :  { %v168_v50 = vpop.f32.mrf.mxu0 }
  0xbf   :  { %v209_v52 = vmax.f32 %v186_v49, 0.0  ;;  %v169_v54 = vadd.f32 %v554_v25, %v168_v50 }
  0xc1   :  { %v219_v53 = vpack.c.bf16 %v209_v52, %v208_v51  ;;  %v202_v57 = vmax.f32 %v169_v54, 0.0 }
  0xc3   :  { %319 = vmatmul.bf16.gmra.mxu3 %v219_v53 }
  0xc4   :  { %v188_v55 = vpop.f32.mrf.mxu2 }
  0xc5   :  { %v189_v60 = vadd.f32 %v554_v25, %v188_v55 }
  0xc6   :  { %v170_v56 = vpop.f32.mrf.mxu0 }
  0xc7   :  { %v171_v58 = vadd.f32 %v554_v25, %v170_v56  ;;  %v210_v1 = vmax.f32 %v189_v60, 0.0 }
  0xc9   :  { %v203_v59 = vmax.f32 %v171_v58, 0.0 }
  0xcb   :  { %v216_v61 = vpack.c.bf16 %v203_v59, %v202_v57 }
  0xcc   :  { %v190_v62 = vpop.f32.mrf.mxu2 }
  0xcd   :  { %v191_v63 = vadd.f32 %v554_v25, %v190_v62  ;;  %304 = vmatmul.bf16.gmra.mxu1 %v216_v61 }
  0xce   :  { %v173_v0 = vpop.f32.mrf.mxu0 }
  0xcf   :  { %v211_v2 = vmax.f32 %v191_v63, 0.0  ;;  %v174_v4 = vadd.f32 %v554_v25, %v173_v0 }
  0xd1   :  { %v220_v3 = vpack.c.bf16 %v211_v2, %v210_v1  ;;  %v204_v7 = vmax.f32 %v174_v4, 0.0 }
  0xd3   :  { %324 = vmatmul.bf16.gmra.mxu3 %v220_v3 }
  0xd4   :  { %v193_v5 = vpop.f32.mrf.mxu2 }
  0xd5   :  { %v194_v10 = vadd.f32 %v554_v25, %v193_v5 }
  0xd6   :  { %v175_v6 = vpop.f32.mrf.mxu0 }
  0xd7   :  { %v176_v8 = vadd.f32 %v554_v25, %v175_v6  ;;  %v212_v14 = vmax.f32 %v194_v10, 0.0 }
  0xd9   :  { %v205_v9 = vmax.f32 %v176_v8, 0.0 }
  0xdb   :  { %v217_v11 = vpack.c.bf16 %v205_v9, %v204_v7 }
  0xdc   :  { %v195_v12 = vpop.f32.mrf.mxu2 }
  0xdd   :  { %v196_v13 = vadd.f32 %v554_v25, %v195_v12  ;;  %309 = vmatmul.bf16.gmra.mxu1 %v217_v11 }
  0xdf   :  { %v213_v15 = vmax.f32 %v196_v13, 0.0 }
  0xe1   :  { %v221_v16 = vpack.c.bf16 %v213_v15, %v212_v14 }
  0xe3   :  { %329 = vmatmul.bf16.gmra.mxu3 %v221_v16 }
 0x12a   :  { %v295_v17 = vpop.f32.mrf.mxu1 }
 0x132   :  { %v297_v18 = vpop.f32.mrf.mxu1 }
 0x133   :  { %v494_v19 = vpack.c.bf16 %v297_v18, %v295_v17 }
 0x135   :  { %495 = vst [vmem:[%s683_s4] sm:$0xff] %v494_v19  }
 0x136   :  { %v315_v20 = vpop.f32.mrf.mxu3 }
 0x13a   :  { %v300_v21 = vpop.f32.mrf.mxu1 }
 0x13e   :  { %v317_v22 = vpop.f32.mrf.mxu3 }
 0x13f   :  { %v514_v23 = vpack.c.bf16 %v317_v22, %v315_v20 }
 0x141   :  { %534 = vst [vmem:[%s683_s4 + $0x20] sm:$0xff] %v514_v23  }
 0x142   :  { %v302_v24 = vpop.f32.mrf.mxu1 }
 0x143   :  { %v499_v25 = vpack.c.bf16 %v302_v24, %v300_v21 }
 0x145   :  { %531 = vst [vmem:[%s683_s4 + $0x8] sm:$0xff] %v499_v25  }
 0x146   :  { %v320_v26 = vpop.f32.mrf.mxu3 }
 0x14a   :  { %v305_v27 = vpop.f32.mrf.mxu1 }
 0x14e   :  { %v322_v28 = vpop.f32.mrf.mxu3 }
 0x14f   :  { %v519_v29 = vpack.c.bf16 %v322_v28, %v320_v26 }
 0x151   :  { %535 = vst [vmem:[%s683_s4 + $0x28] sm:$0xff] %v519_v29  }
 0x152   :  { %v307_v30 = vpop.f32.mrf.mxu1 }
 0x153   :  { %v504_v31 = vpack.c.bf16 %v307_v30, %v305_v27 }
 0x155   :  { %532 = vst [vmem:[%s683_s4 + $0x10] sm:$0xff] %v504_v31  }
 0x156   :  { %v325_v32 = vpop.f32.mrf.mxu3 }
 0x15a   :  { %v310_v33 = vpop.f32.mrf.mxu1 }
 0x15e   :  { %v327_v34 = vpop.f32.mrf.mxu3 }
 0x15f   :  { %v524_v35 = vpack.c.bf16 %v327_v34, %v325_v32 }
 0x161   :  { %536 = vst [vmem:[%s683_s4 + $0x30] sm:$0xff] %v524_v35  }
 0x162   :  { %v312_v36 = vpop.f32.mrf.mxu1 }
 0x163   :  { %v509_v37 = vpack.c.bf16 %v312_v36, %v310_v33 }
 0x165   :  { %533 = vst [vmem:[%s683_s4 + $0x18] sm:$0xff] %v509_v37  }
 0x166   :  { %v330_v38 = vpop.f32.mrf.mxu3 }
 0x16e   :  { %v332_v39 = vpop.f32.mrf.mxu3 }
 0x16f   :  { %v529_v40 = vpack.c.bf16 %v332_v39, %v330_v38 }
 0x171   :  { %537 = vst [vmem:[%s683_s4 + $0x38] sm:$0xff] %v529_v40  }

// kernel: gcn_forward.3
= control target key start
LH: loop header
LB: loop body
LE: loop exit
PB: predicated region body
PF: predicated region fallthrough
CT: control target
= control target key end

     0   :  { %s462_s1 = inlined_call_operand.vmem [shape: bf16[128,128], index: 1, kind: input, shape index: {}]   ;;  %s463_s0 = inlined_call_operand.vmem [shape: bf16[128,128], index: 0, kind: input, shape index: {}]   ;;  %s464_s2 = inlined_call_operand.vmem [shape: bf16[128,128], index: 2, kind: output, shape index: {}]  }
   0x1   :  { %v303_v0 = vld [vmem:[%s462_s1 + $0x38] sm:$0xff]  ;;  %v302_v1 = vld [vmem:[%s462_s1 + $0x30] sm:$0xff]  ;;  %v301_v2 = vld [vmem:[%s462_s1 + $0x28] sm:$0xff] }
   0x2   :  { %139 = vmatpush.bf16.msra.mxu0 %v303_v0  ;;  %351 = vmatpush.bf16.msra.mxu1 %v303_v0  ;;  %v300_v3 = vld [vmem:[%s462_s1 + $0x20] sm:$0xff]  ;;  %v299_v4 = vld [vmem:[%s462_s1 + $0x18] sm:$0xff]  ;;  %v298_v5 = vld [vmem:[%s462_s1 + $0x10] sm:$0xff] }
   0x3   :  { %352 = vmatpush.bf16.msra.mxu2 %v303_v0  ;;  %353 = vmatpush.bf16.msra.mxu3 %v303_v0  ;;  %v297_v6 = vld [vmem:[%s462_s1 + $0x8] sm:$0xff]  ;;  %v296_v7 = vld [vmem:[%s462_s1] sm:$0xff]  ;;  %v290_v9 = vld [vmem:[%s463_s0 + $0x10] sm:$0xff] }
   0x4   :  { %v288_v8 = vld [vmem:[%s463_s0] sm:$0xff]  ;;  %v294_v11 = vld [vmem:[%s463_s0 + $0x30] sm:$0xff]  ;;  %v289_v12 = vld [vmem:[%s463_s0 + $0x8] sm:$0xff] }
   0x5   :  { %v292_v10 = vld [vmem:[%s463_s0 + $0x20] sm:$0xff]  ;;  %v291_v13 = vld [vmem:[%s463_s0 + $0x18] sm:$0xff]  ;;  %v293_v14 = vld [vmem:[%s463_s0 + $0x28] sm:$0xff] }
   0x6   :  { %140 = vmatpush.bf16.msra.mxu0 %v302_v1  ;;  %354 = vmatpush.bf16.msra.mxu1 %v302_v1  ;;  %v295_v15 = vld [vmem:[%s463_s0 + $0x38] sm:$0xff] }
   0x7   :  { %355 = vmatpush.bf16.msra.mxu2 %v302_v1  ;;  %356 = vmatpush.bf16.msra.mxu3 %v302_v1 }
   0xa   :  { %141 = vmatpush.bf16.msra.mxu0 %v301_v2  ;;  %357 = vmatpush.bf16.msra.mxu1 %v301_v2 }
   0xb   :  { %358 = vmatpush.bf16.msra.mxu2 %v301_v2  ;;  %359 = vmatpush.bf16.msra.mxu3 %v301_v2 }
   0xe   :  { %142 = vmatpush.bf16.msra.mxu0 %v300_v3  ;;  %360 = vmatpush.bf16.msra.mxu1 %v300_v3 }
   0xf   :  { %361 = vmatpush.bf16.msra.mxu2 %v300_v3  ;;  %362 = vmatpush.bf16.msra.mxu3 %v300_v3 }
  0x12   :  { %143 = vmatpush.bf16.msra.mxu0 %v299_v4  ;;  %363 = vmatpush.bf16.msra.mxu1 %v299_v4 }
  0x13   :  { %364 = vmatpush.bf16.msra.mxu2 %v299_v4  ;;  %365 = vmatpush.bf16.msra.mxu3 %v299_v4 }
  0x16   :  { %144 = vmatpush.bf16.msra.mxu0 %v298_v5  ;;  %366 = vmatpush.bf16.msra.mxu1 %v298_v5 }
  0x17   :  { %367 = vmatpush.bf16.msra.mxu2 %v298_v5  ;;  %368 = vmatpush.bf16.msra.mxu3 %v298_v5 }
  0x1a   :  { %145 = vmatpush.bf16.msra.mxu0 %v297_v6  ;;  %369 = vmatpush.bf16.msra.mxu1 %v297_v6 }
  0x1b   :  { %370 = vmatpush.bf16.msra.mxu2 %v297_v6  ;;  %371 = vmatpush.bf16.msra.mxu3 %v297_v6 }
  0x1e   :  { %146 = vmatpush.bf16.msra.mxu0 %v296_v7  ;;  %372 = vmatpush.bf16.msra.mxu1 %v296_v7 }
  0x1f   :  { %373 = vmatpush.bf16.msra.mxu2 %v296_v7  ;;  %374 = vmatpush.bf16.msra.mxu3 %v296_v7 }
  0x21   :  { %147 = vmatmul.bf16.vlgmr.msra.gmra.mxu0 %v288_v8  ;;  %157 = vmatmul.bf16.vlgmr.msra.gmra.mxu1 %v290_v9 }
  0x22   :  { %167 = vmatmul.bf16.vlgmr.msra.gmra.mxu2 %v292_v10  ;;  %177 = vmatmul.bf16.vlgmr.msra.gmra.mxu3 %v294_v11 }
  0x31   :  { %152 = vmatmul.bf16.gmra.mxu0 %v289_v12  ;;  %162 = vmatmul.bf16.gmra.mxu1 %v291_v13 }
  0x32   :  { %172 = vmatmul.bf16.gmra.mxu2 %v293_v14  ;;  %182 = vmatmul.bf16.gmra.mxu3 %v295_v15 }
  0x9e   :  { %v148_v16 = vpop.f32.mrf.mxu0  ;;  %v158_v17 = vpop.f32.mrf.mxu1 }
  0xa5   :  { %v168_v18 = vpop.f32.mrf.mxu2  ;;  %v178_v19 = vpop.f32.mrf.mxu3 }
  0xa6   :  { %v150_v20 = vpop.f32.mrf.mxu0  ;;  %v160_v21 = vpop.f32.mrf.mxu1 }
  0xa7   :  { %v307_v22 = vpack.c.bf16 %v150_v20, %v148_v16  ;;  %v317_v23 = vpack.c.bf16 %v160_v21, %v158_v17 }
  0xa9   :  { %308 = vst [vmem:[%s464_s2] sm:$0xff] %v307_v22  }
  0xaa   :  { %345 = vst [vmem:[%s464_s2 + $0x10] sm:$0xff] %v317_v23  }
  0xad   :  { %v170_v24 = vpop.f32.mrf.mxu2  ;;  %v180_v25 = vpop.f32.mrf.mxu3 }
  0xae   :  { %v327_v26 = vpack.c.bf16 %v170_v24, %v168_v18  ;;  %v337_v27 = vpack.c.bf16 %v180_v25, %v178_v19  ;;  %v153_v28 = vpop.f32.mrf.mxu0  ;;  %v163_v29 = vpop.f32.mrf.mxu1 }
  0xb0   :  { %347 = vst [vmem:[%s464_s2 + $0x20] sm:$0xff] %v327_v26  }
  0xb1   :  { %349 = vst [vmem:[%s464_s2 + $0x30] sm:$0xff] %v337_v27  }
  0xb5   :  { %v173_v30 = vpop.f32.mrf.mxu2  ;;  %v183_v31 = vpop.f32.mrf.mxu3 }
  0xb6   :  { %v155_v32 = vpop.f32.mrf.mxu0  ;;  %v165_v33 = vpop.f32.mrf.mxu1 }
  0xb7   :  { %v312_v34 = vpack.c.bf16 %v155_v32, %v153_v28  ;;  %v322_v35 = vpack.c.bf16 %v165_v33, %v163_v29 }
  0xb9   :  { %344 = vst [vmem:[%s464_s2 + $0x8] sm:$0xff] %v312_v34  }
  0xba   :  { %346 = vst [vmem:[%s464_s2 + $0x18] sm:$0xff] %v322_v35  }
  0xbd   :  { %v175_v36 = vpop.f32.mrf.mxu2  ;;  %v185_v37 = vpop.f32.mrf.mxu3 }
  0xbe   :  { %v332_v38 = vpack.c.bf16 %v175_v36, %v173_v30  ;;  %v342_v39 = vpack.c.bf16 %v185_v37, %v183_v31 }
  0xc0   :  { %348 = vst [vmem:[%s464_s2 + $0x28] sm:$0xff] %v332_v38  }
  0xc1   :  { %350 = vst [vmem:[%s464_s2 + $0x38] sm:$0xff] %v342_v39  }

</bundles_post_ra>
